<compile_context>
chip_gen: v7x
topology: tpu7x:2x2x1
jax: 0.10.0
libtpu: 0.0.40
codegen_flags: <defaults>
</compile_context>

<pallas_src>
import jax
import jax.numpy as jnp
from jax.experimental import pallas as pl
from jax.experimental.pallas import tpu as pltpu

_LANE = 128


def _sublane_align(dtype) -> int:
    itemsize = jnp.dtype(dtype).itemsize
    if itemsize >= 4:
        return 8
    if itemsize == 2:
        return 16
    return 32


def _round_up(x: int, m: int) -> int:
    return ((x + m - 1) // m) * m


def _pick_block(total: int, align: int, max_block: int) -> int:
    """Block size for a cdiv grid over `total`, never exceeding `max_block`.

    If the whole extent fits in budget, use it (full-extent block dims are
    always legal).  Otherwise prefer an aligned exact divisor (no masked edge
    tile); failing that, the largest aligned size within budget (only the
    final edge tile is masked)."""
    max_block = max(align, (max_block // align) * align)
    if total <= max_block:
        return total
    b = max_block
    while b >= align:
        if total % b == 0:
            return b
        b -= align
    return max_block


def _affine_kernel(sb_ref, x_ref, o_ref):
    # sb_ref: (row_block, 2) float32 — col 0 = scale, col 1 = bias.
    # x_ref / o_ref: (row_block, col_block) tiles (lane-dense last dim).
    sb = sb_ref[...]
    scale = sb[:, 0:1]
    bias = sb[:, 1:2]
    x = x_ref[...].astype(jnp.float32)
    o_ref[...] = (x * scale + bias).astype(o_ref.dtype)


def normalize_pallas(x, mean, std, *, target_block_bytes=2 * 1024 * 1024):
    """Per-channel normalize of an NCHW tensor via a lane-dense Pallas TPU kernel."""
    n, c, h, w = x.shape
    rows, cols = n * c, h * w
    itemsize = jnp.dtype(x.dtype).itemsize
    sub = _sublane_align(x.dtype)

    # Fold (x - mean)/std into x*scale + bias in f32; pack per-row params into
    # a single (rows, 2) slab: col 0 = scale, col 1 = bias.
    scale_c = 1.0 / jnp.asarray(std, dtype=jnp.float32)          # (C,)
    bias_c = -jnp.asarray(mean, dtype=jnp.float32) * scale_c     # (C,)
    sb_rows = jnp.stack([jnp.tile(scale_c, n), jnp.tile(bias_c, n)], axis=-1)

    x2 = x.reshape(rows, cols)                                   # lane-dense slab

    # Column block: multiple of 128 (or full extent), bounded by budget.
    col_cap = max(_LANE, min(8 * 1024, target_block_bytes // (sub * itemsize)))
    col_block = _pick_block(cols, _LANE, col_cap)

    # Row block: sublane-aligned (or full extent), x tile ~target_block_bytes.
    max_rows = max(sub, target_block_bytes // (col_block * itemsize))
    total_bytes = rows * cols * itemsize
    if total_bytes > (4 << 20) and rows >= 2 * sub:
        # v7x megacore: keep >=2 blocks on the parallel row axis so both
        # TensorCores stream when the input is non-trivially sized.
        max_rows = min(max_rows, max(sub, (((rows + 1) // 2) // sub) * sub))
    row_block = _pick_block(rows, sub, max_rows)

    grid = (pl.cdiv(rows, row_block), pl.cdiv(cols, col_block))

    # Explicit VMEM budget: double-buffered x + out tiles, lane-padded param
    # tile, plus headroom for compiler-internal scratch.  Clamp to the scoped
    # default (32 MiB) so this is safe on v5e/v6e/v7x.
    x_tile = row_block * col_block * itemsize
    sb_tile = _round_up(row_block, sub) * _LANE * 4
    vmem_limit = int(2 * (2 * x_tile + sb_tile) + (2 << 20))
    vmem_limit = min(max(vmem_limit, 4 << 20), 32 << 20)

    out2 = pl.pallas_call(
        _affine_kernel,
        out_shape=jax.ShapeDtypeStruct((rows, cols), x.dtype),
        grid=grid,
        in_specs=[
            # Constant block index along the innermost (column) axis: the
            # per-row params are DMA'd once per row step, not per column step.
            pl.BlockSpec((row_block, 2), lambda i, j: (i, 0)),
            pl.BlockSpec((row_block, col_block), lambda i, j: (i, j)),
        ],
        out_specs=pl.BlockSpec((row_block, col_block), lambda i, j: (i, j)),
        compiler_params=pltpu.CompilerParams(
            dimension_semantics=("parallel", "parallel"),
            vmem_limit_bytes=vmem_limit,
        ),
    )(sb_rows, x2)

    return out2.reshape(n, c, h, w)


class Wrapper:
    """JAX equivalent of the PyTorch Wrapper: forwards to `transform`."""

    def __init__(self, transform):
        self.transform = transform

    def __call__(self, *args, **kwargs):
        return self.transform(*args, **kwargs)

    # forward == __call__
    def forward(self, *args, **kwargs):
        return self.transform(*args, **kwargs)

    def invert(self, x):
        return x


def _reference(x, mean, std):
    return (x - mean[None, :, None, None]) / std[None, :, None, None]


if __name__ == "__main__":
    key = jax.random.PRNGKey(0)

    # --- Primary check: small NCHW input, lane-dense cols (H*W = 256) -------
    N, C, H, W = 2, 4, 16, 16
    x = jax.random.normal(key, (N, C, H, W), dtype=jnp.float32)
    mean = jnp.arange(C, dtype=jnp.float32) * 0.1          # [0.0, 0.1, 0.2, 0.3]
    std = 1.0 + jnp.arange(C, dtype=jnp.float32) * 0.05    # [1.0, 1.05, 1.1, 1.15]

    wrapper = Wrapper(lambda t: normalize_pallas(t, mean, std))
    out = jax.block_until_ready(wrapper(x))
    ref = _reference(x, mean, std)
    assert out.shape == x.shape and out.dtype == x.dtype
    assert jnp.allclose(out, ref, atol=1e-5, rtol=1e-5)

    # invert is identity, as in the PyTorch module
    inv = wrapper.invert(out)
    assert inv is out

    # --- Secondary check: force a multi-step column grid (tiny tile budget) -
    k2 = jax.random.PRNGKey(1)
    x2 = jax.random.normal(k2, (2, 4, 32, 36), dtype=jnp.float32)  # cols = 1152
    out2 = jax.block_until_ready(
        normalize_pallas(x2, mean, std, target_block_bytes=8 * 1024))
    assert jnp.allclose(out2, _reference(x2, mean, std), atol=1e-5, rtol=1e-5)

    # --- Third check: non-128-multiple cols / non-8-multiple rows (edge mask)
    k3 = jax.random.PRNGKey(2)
    C3 = 3
    x3 = jax.random.normal(k3, (2, C3, 20, 20), dtype=jnp.float32)  # rows=6, cols=400
    mean3 = jnp.arange(C3, dtype=jnp.float32) * 0.2
    std3 = 1.0 + jnp.arange(C3, dtype=jnp.float32) * 0.1
    out3 = jax.block_until_ready(normalize_pallas(x3, mean3, std3))
    assert jnp.allclose(out3, _reference(x3, mean3, std3), atol=1e-5, rtol=1e-5)

    print("KERNEL_OK")
</pallas_src>

<mosaic_0001>
module attributes {stable_mosaic.version = 11 : i64} {
  func.func @_affine_kernel(%arg0: i32, %arg1: i32, %arg2: memref<8x2xf32, #tpu.memory_space<vmem>>, %arg3: memref<8x256xf32, #tpu.memory_space<vmem>>, %arg4: memref<8x256xf32, #tpu.memory_space<vmem>>) attributes {dimension_semantics = [#tpu.dimension_semantics<parallel>, #tpu.dimension_semantics<parallel>], iteration_bounds = array<i64: 1, 1>, scalar_prefetch = 0 : i64, scratch_operands = 0 : i64, tpu.core_type = #tpu.core_type<tc>, window_params = [{transform_indices = @transform_0, window_bounds = array<i64: 8, 2>}, {transform_indices = @transform_1, window_bounds = array<i64: 8, 256>}, {transform_indices = @transform_2, window_bounds = array<i64: 8, 256>}]} {
    %c0 = arith.constant 0 : index
    %c0_0 = arith.constant 0 : index
    %0 = vector.load %arg2[%c0, %c0_0] : memref<8x2xf32, #tpu.memory_space<vmem>>, vector<8x2xf32>
    %1 = vector.extract_strided_slice %0 {offsets = [0, 0], sizes = [8, 1], strides = [1, 1]} : vector<8x2xf32> to vector<8x1xf32>
    %2 = vector.extract_strided_slice %0 {offsets = [0, 1], sizes = [8, 1], strides = [1, 1]} : vector<8x2xf32> to vector<8x1xf32>
    %c0_1 = arith.constant 0 : index
    %c0_2 = arith.constant 0 : index
    %3 = vector.load %arg3[%c0_1, %c0_2] : memref<8x256xf32, #tpu.memory_space<vmem>>, vector<8x256xf32>
    %4 = vector.broadcast %1 : vector<8x1xf32> to vector<8x256xf32>
    %5 = arith.mulf %3, %4 : vector<8x256xf32>
    %6 = vector.broadcast %2 : vector<8x1xf32> to vector<8x256xf32>
    %7 = arith.addf %5, %6 : vector<8x256xf32>
    %c0_3 = arith.constant 0 : index
    %c0_4 = arith.constant 0 : index
    %8 = vector.load %arg4[%c0_3, %c0_4] : memref<8x256xf32, #tpu.memory_space<vmem>>, vector<8x256xf32>
    tpu.vector_store %arg4[%c0_3, %c0_4], %7 {strides = array<i32>} : memref<8x256xf32, #tpu.memory_space<vmem>>, vector<8x256xf32>,
    return
  }
  func.func @transform_0(%arg0: i32, %arg1: i32) -> (i32, i32) {
    %c0_i32 = arith.constant 0 : i32
    %c0_i32_0 = arith.constant 0 : i32
    return %arg0, %c0_i32 : i32, i32
  }
  func.func @transform_1(%arg0: i32, %arg1: i32) -> (i32, i32) {
    %c0_i32 = arith.constant 0 : i32
    return %arg0, %arg1 : i32, i32
  }
  func.func @transform_2(%arg0: i32, %arg1: i32) -> (i32, i32) {
    %c0_i32 = arith.constant 0 : i32
    return %arg0, %arg1 : i32, i32
  }
}

</mosaic_0001>

<bundles_post_ra>
// kernel: tpu_custom_call.1
= control target key start
LH: loop header
LB: loop body
LE: loop exit
PB: predicated region body
PF: predicated region fallthrough
CT: control target
= control target key end

     0   :  { %7 = vsyncpa [#allocation3], 0  ;;  %s157_s0 = inlined_call_operand.vmem [shape: f32[8,2], index: 0, kind: input, shape index: {}]   ;;  %s158_s1 = inlined_call_operand.hbm [shape: f32[8,256], index: 1, kind: input, shape index: {}]   ;;  %s159_s2 = inlined_call_operand.hbm [shape: f32[8,256], index: 2, kind: output, shape index: {}]  }
   0x1   :  { %8 = vsyncpa [#allocation4], 0  ;;  %s111_s9 = smov [#allocation2]   ;;  %s63_s13 = scalar_lea.hbm %s158_s1, 256 }
   0x2   :  { %s17_s10 = sshll.u32 %s111_s9, 4  ;;  %p64_p0 = scmp.ne.s32.totalorder %s158_s1, %s63_s13  ;;  %s18_s10 = int_to_ptr.vmem [resolvable:$true] %s17_s10 }
   0x3   :  { %p67_p1 = scmp.lt.u32.totalorder %s63_s13, %s158_s1 }
   0x5   :  { %p69_p2 = pnand %p67_p1, %p64_p0 }
   0x7   :  { %72 = shalt.err (!%p69_p2)
}
   0x8   :  { %s73_s18 = scalar_lea.vmem %s18_s10, 256  ;;  %p78_p4 = scmp.lt.s32.totalorder %s18_s10, %s18_s10 }
   0x9   :  { %p74_p3 = scmp.ne.s32.totalorder %s18_s10, %s73_s18  ;;  %p79_p5 = scmp.lt.s32.totalorder %s73_s18, %s73_s18 }
   0xb   :  { %p80_p6 = por %p79_p5, %p78_p4 }
   0xd   :  { %p81_p7 = pnand %p80_p6, %p74_p3 }
   0xf   :  { %84 = shalt.err (!%p81_p7)
}
  0x10   :  { %20 = dma.hbm_to_vmem [thread:$0]  %s158_s1, 256, %s18_s10, [#allocation3]  }
  0x11   :  { %107 = dma.done.wait [#allocation3], 256  }
  0x12   :  { %108 = vsyncadd [#allocation3], 4294967040  ;;  %v112_v0 = vmov 0   ;;  %v24_v1 = vld [vmem:[%s157_s0] sm:$0xff]  ;;  %v113_v2 = vmov 1   ;;  %v26_v5 = vld [vmem:[#allocation2 + $0x8] sm:$0xff] }
  0x13   :  { %61 = vset.pattern.permute.xlu0 %v112_v0  ;;  %v25_v4 = vld [vmem:[#allocation2] sm:$0xff]  ;;  %s114_s23 = smov [#allocation5]  }
  0x14   :  { %29 = vperm.xlu0 %61, %v24_v1   ;;  %s48_s24 = sshll.u32 %s114_s23, 4  ;;  %s49_s24 = int_to_ptr.vmem [resolvable:$true] %s48_s24 }
  0x15   :  { %s85_s1 = scalar_lea.vmem %s49_s24, 256  ;;  %p90_p9 = scmp.lt.s32.totalorder %s49_s24, %s49_s24 }
  0x16   :  { %p86_p8 = scmp.ne.s32.totalorder %s49_s24, %s85_s1  ;;  %p91_p10 = scmp.lt.s32.totalorder %s85_s1, %s85_s1 }
  0x18   :  { %62 = vset.pattern.permute.xlu0 %v113_v2  ;;  %p92_p11 = por %p91_p10, %p90_p9 }
  0x19   :  { %35 = vperm.xlu0 %62, %v24_v1  }
  0x1a   :  { %p93_p12 = pnand %p92_p11, %p86_p8 }
  0x93   :  { %v30_v3 = vpop.permute.xlu0 %29 }
  0x94   :  { %v32_v6 = vmul.f32 %v30_v3, %v25_v4  ;;  %v33_v7 = vmul.f32 %v30_v3, %v26_v5 }
  0x98   :  { %v36_v8 = vpop.permute.xlu0 %35 }
  0x99   :  { %v38_v9 = vadd.f32 %v36_v8, %v32_v6  ;;  %v39_v10 = vadd.f32 %v36_v8, %v33_v7 }
  0x9b   :  { %40 = vst [vmem:[#allocation5] sm:$0xff] %v38_v9  ;;  %41 = vst [vmem:[#allocation5 + $0x8] sm:$0xff] %v39_v10 }
  0x9c   :  { %96 = shalt.err (!%p93_p12)
}
  0x9d   :  { %s97_s26 = scalar_lea.hbm %s159_s2, 256 }
  0x9e   :  { %p98_p13 = scmp.ne.s32.totalorder %s159_s2, %s97_s26  ;;  %p101_p0 = scmp.lt.u32.totalorder %s97_s26, %s159_s2 }
  0xa0   :  { %p103_p1 = pnand %p101_p0, %p98_p13 }
  0xa2   :  { %106 = shalt.err (!%p103_p1)
}
  0xa3   :  { %51 = dma.vmem_to_hbm [thread:$0]  %s49_s24, 256, %s159_s2, [#allocation4]  }
  0xa4   :  { %109 = dma.done.wait [#allocation4], 256  }
  0xa5   :  { %110 = vsyncadd [#allocation4], 4294967040 }
  0xa6   :  { %55 = vsyncpa [#allocation3], 1 }
  0xa7   :  { %56 = vsyncpa [#allocation4], 1 }

</bundles_post_ra>
